<compile_context>
chip_gen: v7x
topology: tpu7x:2x2x1
jax: 0.10.0
libtpu: 0.0.40
codegen_flags: <defaults>
</compile_context>

<pallas_src>
import math
import jax
import jax.numpy as jnp
from jax import lax
from jax.experimental import pallas as pl
from jax.experimental.pallas import tpu as pltpu


# ---------------------------------------------------------------------------
# Kernel A: batched gate pre-activations + LSTM recurrence.
# ---------------------------------------------------------------------------
def _lstm_kernel(emb_ref, h0_ref, c0_ref, w_ih_ref, w_hh_ref, b_g_ref,
                 h_all_ref, xg_scr):
    """emb (T*Bp, E) bf16 time-major; h0/c0 (Bp, H) f32; w_ih (E,4H) bf16;
    w_hh (H,4H) bf16; b_g (1,4H) f32; h_all out (T*Bp, H) bf16."""
    Bp, H = h0_ref.shape
    rows = emb_ref.shape[0]
    T = rows // Bp

    # Phase 1: input contributions to the gates for ALL T steps in one MXU call.
    xg_scr[...] = (
        jnp.dot(emb_ref[...], w_ih_ref[...],
                preferred_element_type=jnp.float32)
        + b_g_ref[...])                                        # (T*Bp, 4H) f32

    # Recurrent weights in f32 for the serial part: avoids per-step bf16
    # rounding drift; the recurrent matmul is tiny vs. phases 1/3.
    w_hh = w_hh_ref[...].astype(jnp.float32)

    # Gate-selection lane mask hoisted out of the loop (broadcasts aren't
    # CSE'd).  One tanh pass + one sigmoid pass on the packed (Bp, 4H) tile,
    # blended by lane index, instead of four sub-vreg activations per step.
    lane = lax.broadcasted_iota(jnp.int32, (Bp, 4 * H), 1)
    g_mask = (lane >= 2 * H) & (lane < 3 * H)

    def step(t, carry):
        h, c = carry
        row = pl.multiple_of(t * Bp, Bp)
        gates = xg_scr[pl.ds(row, Bp), :] + jnp.dot(
            h, w_hh, preferred_element_type=jnp.float32)       # (Bp, 4H) f32
        act = jnp.where(g_mask, jnp.tanh(gates), jax.nn.sigmoid(gates))
        i_g = act[:, 0 * H:1 * H]
        f_g = act[:, 1 * H:2 * H]
        g_g = act[:, 2 * H:3 * H]
        o_g = act[:, 3 * H:4 * H]
        c_new = f_g * c + i_g * g_g
        h_new = o_g * jnp.tanh(c_new)
        h_all_ref[pl.ds(row, Bp), :] = h_new.astype(h_all_ref.dtype)
        return h_new, c_new

    unroll = T if T <= 8 else 8          # cap unroll: avoid vreg spills at long T
    lax.fori_loop(0, T, step, (h0_ref[...], c0_ref[...]), unroll=unroll)


# ---------------------------------------------------------------------------
# Kernel B: output projection + log-softmax, tiled over rows and V (two-pass).
# ---------------------------------------------------------------------------
def _proj_logsoftmax_kernel(hs_ref, w_ref, b_ref, pred_ref, m_scr, l_scr):
    """hs (TR, H) bf16; w (H, TV) bf16; b (1, TV) f32; pred (TR, TV)."""
    p = pl.program_id(1)        # 0: accumulate row max / sum-exp; 1: write out
    v = pl.program_id(2)        # V tile

    logits = (jnp.dot(hs_ref[...], w_ref[...],
                      preferred_element_type=jnp.float32)
              + b_ref[...])                                    # (TR, TV) f32

    @pl.when((p == 0) & (v == 0))
    def _():
        m_scr[...] = jnp.full(m_scr.shape, -1e30, m_scr.dtype)
        l_scr[...] = jnp.zeros(l_scr.shape, l_scr.dtype)

    @pl.when(p == 0)
    def _():
        m_old = m_scr[...]
        m_new = jnp.maximum(m_old, jnp.max(logits, axis=-1, keepdims=True))
        l_scr[...] = (l_scr[...] * jnp.exp(m_old - m_new)
                      + jnp.sum(jnp.exp(logits - m_new), axis=-1,
                                keepdims=True))
        m_scr[...] = m_new

    @pl.when(p == 1)
    def _():
        lse = m_scr[...] + jnp.log(l_scr[...])
        pred_ref[...] = (logits - lse).astype(pred_ref.dtype)


def _largest_tile(total, step, cap):
    """Largest multiple of `step` that divides `total` and is <= cap."""
    best = step
    t = step
    while t <= min(total, cap):
        if total % t == 0:
            best = t
        t += step
    return best


def generator_forward(inp, hidden, params, out_dtype=jnp.float32):
    """inp: (B, T) or (B,) int32 tokens; hidden: (h, c), each (1, B, H).

    Returns pred of shape (B*T, V), rows ordered (b, t) — matching PyTorch's
    out.contiguous().view(-1, hidden_dim) for a batch_first LSTM.
    """
    emb_table = params["embedding"]        # (V, E)  f32
    w_ih = params["w_ih"]                  # (E, 4H) bf16
    w_hh = params["w_hh"]                  # (H, 4H) bf16
    b_g = params["b_gates"]                # (1, 4H) f32
    w_out = params["w_out"]                # (H, V)  bf16
    b_out = params["b_out"]                # (1, V)  f32
    h0, c0 = hidden

    if inp.ndim == 1:
        inp = inp[:, None]                 # mirrors emb.unsqueeze(1)
    B, T = inp.shape
    E = emb_table.shape[1]
    H = w_hh.shape[0]
    V = w_out.shape[1]

    # Pad batch to a multiple of 8 (sublane-dense per-step work).
    Bp = max(8, -(-B // 8) * 8)
    if Bp != B:
        inp_p = jnp.concatenate(
            [inp, jnp.zeros((Bp - B, T), inp.dtype)], axis=0)
        h0_p = jnp.concatenate(
            [h0[0], jnp.zeros((Bp - B, H), h0.dtype)], axis=0)
        c0_p = jnp.concatenate(
            [c0[0], jnp.zeros((Bp - B, H), c0.dtype)], axis=0)
    else:
        inp_p, h0_p, c0_p = inp, h0[0], c0[0]

    rows = T * Bp

    # Embedding gather (wrapper glue) directly in time-major order, bf16.
    emb_tm = jnp.take(emb_table, inp_p.T, axis=0)        # (T, Bp, E)
    emb_flat = emb_tm.reshape(rows, E).astype(w_ih.dtype)

    # ---- Kernel A: recurrence ------------------------------------------------
    est_a = (2 * (rows * E * 2 + 2 * Bp * H * 4
                  + E * 4 * H * 2 + H * 4 * H * 2 + 4 * H * 4
                  + rows * H * 2)
             + rows * 4 * H * 4 + (1 << 20))
    h_all = pl.pallas_call(
        _lstm_kernel,
        out_shape=jax.ShapeDtypeStruct((rows, H), jnp.bfloat16),
        grid_spec=pltpu.PrefetchScalarGridSpec(
            num_scalar_prefetch=0,
            grid=(1,),
            in_specs=[
                pl.BlockSpec((rows, E), lambda i: (0, 0)),     # emb (flat)
                pl.BlockSpec((Bp, H), lambda i: (0, 0)),       # h0
                pl.BlockSpec((Bp, H), lambda i: (0, 0)),       # c0
                pl.BlockSpec((E, 4 * H), lambda i: (0, 0)),    # W_ih^T
                pl.BlockSpec((H, 4 * H), lambda i: (0, 0)),    # W_hh^T
                pl.BlockSpec((1, 4 * H), lambda i: (0, 0)),    # gate bias
            ],
            out_specs=pl.BlockSpec((rows, H), lambda i: (0, 0)),
            scratch_shapes=[pltpu.VMEM((rows, 4 * H), jnp.float32)],
        ),
        compiler_params=pltpu.CompilerParams(
            dimension_semantics=("arbitrary",),
            vmem_limit_bytes=int(min(max(2 * est_a, 32 * 1024 * 1024),
                                     60 * 1024 * 1024))),
    )(emb_flat, h0_p, c0_p, w_ih, w_hh, b_g)

    # ---- Kernel B: projection + log-softmax, tiled over V --------------------
    # Pad V to a lane-aligned multiple of 128; padded columns get a very
    # negative bias so they contribute ~0 to the softmax denominator.
    Vp = -(-V // 128) * 128
    if Vp != V:
        w_out = jnp.concatenate(
            [w_out, jnp.zeros((H, Vp - V), w_out.dtype)], axis=1)
        b_out = jnp.concatenate(
            [b_out, jnp.full((1, Vp - V), -1e30, b_out.dtype)], axis=1)

    tile_r = _largest_tile(rows, 8, 512)
    tile_v = _largest_tile(Vp, 128, 512)     # multiple of 128 (and 256 when possible)
    nr, nv = rows // tile_r, Vp // tile_v

    est_b = (2 * (tile_r * H * 2 + H * tile_v * 2 + tile_v * 4
                  + tile_r * tile_v * 4)
             + 2 * tile_r * 4 + (1 << 20))

    pred_flat = pl.pallas_call(
        _proj_logsoftmax_kernel,
        out_shape=jax.ShapeDtypeStruct((rows, Vp), out_dtype),
        grid_spec=pltpu.PrefetchScalarGridSpec(
            num_scalar_prefetch=0,
            grid=(nr, 2, nv),
            in_specs=[
                pl.BlockSpec((tile_r, H), lambda r, p, v: (r, 0)),   # h_all
                pl.BlockSpec((H, tile_v), lambda r, p, v: (0, v)),   # W_out^T
                pl.BlockSpec((1, tile_v), lambda r, p, v: (0, v)),   # out bias
            ],
            # During the reduction pass (p==0) the output block index is pinned
            # to (r, 0): nothing is written back until pass p==1 stores real
            # log-probs, avoiding garbage writebacks.
            out_specs=pl.BlockSpec((tile_r, tile_v),
                                   lambda r, p, v: (r, p * v)),
            scratch_shapes=[pltpu.VMEM((tile_r, 1), jnp.float32),   # running max
                            pltpu.VMEM((tile_r, 1), jnp.float32)],  # running sum-exp
        ),
        compiler_params=pltpu.CompilerParams(
            dimension_semantics=("parallel", "arbitrary", "arbitrary"),
            vmem_limit_bytes=int(min(max(2 * est_b, 32 * 1024 * 1024),
                                     60 * 1024 * 1024))),
    )(h_all, w_out, b_out)

    # Drop V/batch padding, reorder rows to PyTorch (b-major, then t).
    pred = pred_flat[:, :V].reshape(T, Bp, V)[:, :B]     # (T, B, V)
    pred = jnp.transpose(pred, (1, 0, 2)).reshape(B * T, V)
    return pred


def init_generator_params(key, embedding_dim, hidden_dim, vocab_size,
                          padding_idx):
    """Deterministic init mimicking init_params: N(0, 1/sqrt(shape[0]))."""
    E, H, V = embedding_dim, hidden_dim, vocab_size
    ks = jax.random.split(key, 7)

    emb = jax.random.normal(ks[0], (V, E), jnp.float32) / math.sqrt(V)
    emb = emb.at[padding_idx].set(0.0)                 # padding_idx row zeroed

    # nn.LSTM params: weight_ih (4H, E), weight_hh (4H, H), biases (4H,)
    w_ih = jax.random.normal(ks[1], (4 * H, E), jnp.float32) / math.sqrt(4 * H)
    w_hh = jax.random.normal(ks[2], (4 * H, H), jnp.float32) / math.sqrt(4 * H)
    b_ih = jax.random.normal(ks[3], (4 * H,), jnp.float32) / math.sqrt(4 * H)
    b_hh = jax.random.normal(ks[4], (4 * H,), jnp.float32) / math.sqrt(4 * H)

    # nn.Linear(hidden_dim, vocab_size): weight (V, H), bias (V,)
    w_l = jax.random.normal(ks[5], (V, H), jnp.float32) / math.sqrt(V)
    b_l = jax.random.normal(ks[6], (V,), jnp.float32) / math.sqrt(V)

    return {
        "embedding": emb,                                     # (V, E)  f32
        "w_ih": w_ih.T.astype(jnp.bfloat16),                  # (E, 4H) bf16
        "w_hh": w_hh.T.astype(jnp.bfloat16),                  # (H, 4H) bf16
        "b_gates": (b_ih + b_hh)[None, :],                    # (1, 4H) f32
        "w_out": w_l.T.astype(jnp.bfloat16),                  # (H, V)  bf16
        "b_out": b_l[None, :],                                # (1, V)  f32
    }


if __name__ == "__main__":
    # Small shapes consistent with the module.
    embedding_dim = 32
    hidden_dim = 32
    vocab_size = 128
    max_seq_len = 8
    padding_idx = 0
    batch_size = 2

    key = jax.random.PRNGKey(0)
    k_param, k_inp = jax.random.split(key)

    params = init_generator_params(k_param, embedding_dim, hidden_dim,
                                   vocab_size, padding_idx)

    inp = jax.random.randint(k_inp, (batch_size, max_seq_len), 0, vocab_size,
                             dtype=jnp.int32)
    h0 = jnp.zeros((1, batch_size, hidden_dim), jnp.float32)  # init_hidden
    c0 = jnp.zeros((1, batch_size, hidden_dim), jnp.float32)

    pred = generator_forward(inp, (h0, c0), params)
    pred = jax.block_until_ready(pred)

    assert pred.shape == (batch_size * max_seq_len, vocab_size), pred.shape
    # log-softmax rows must (approximately) normalize to 1 in prob space.
    row_sums = jnp.exp(pred).sum(-1)
    assert jnp.allclose(row_sums, 1.0, atol=1e-4), row_sums
    assert jnp.all(jnp.isfinite(pred))

    print("KERNEL_OK")
</pallas_src>

<mosaic_0001>
module attributes {stable_mosaic.version = 11 : i64} {
  func.func @_lstm_kernel(%arg0: i32, %arg1: memref<64x32xbf16, #tpu.memory_space<vmem>>, %arg2: memref<8x32xf32, #tpu.memory_space<vmem>>, %arg3: memref<8x32xf32, #tpu.memory_space<vmem>>, %arg4: memref<32x128xbf16, #tpu.memory_space<vmem>>, %arg5: memref<32x128xbf16, #tpu.memory_space<vmem>>, %arg6: memref<1x128xf32, #tpu.memory_space<vmem>>, %arg7: memref<64x32xbf16, #tpu.memory_space<vmem>>, %arg8: memref<64x128xf32, #tpu.memory_space<vmem>>) attributes {dimension_semantics = [#tpu.dimension_semantics<arbitrary>], iteration_bounds = array<i64: 1>, scalar_prefetch = 0 : i64, scratch_operands = 1 : i64, tpu.core_type = #tpu.core_type<tc>, window_params = [{pipeline_mode = #tpu.pipeline_mode<synchronous>, transform_indices = @transform_0, window_bounds = array<i64: 64, 32>}, {pipeline_mode = #tpu.pipeline_mode<synchronous>, transform_indices = @transform_1, window_bounds = array<i64: 8, 32>}, {pipeline_mode = #tpu.pipeline_mode<synchronous>, transform_indices = @transform_2, window_bounds = array<i64: 8, 32>}, {pipeline_mode = #tpu.pipeline_mode<synchronous>, transform_indices = @transform_3, window_bounds = array<i64: 32, 128>}, {pipeline_mode = #tpu.pipeline_mode<synchronous>, transform_indices = @transform_4, window_bounds = array<i64: 32, 128>}, {pipeline_mode = #tpu.pipeline_mode<synchronous>, transform_indices = @transform_5, window_bounds = array<i64: 1, 128>}, {pipeline_mode = #tpu.pipeline_mode<synchronous>, transform_indices = @transform_6, window_bounds = array<i64: 64, 32>}]} {
    %c0 = arith.constant 0 : index
    %c0_0 = arith.constant 0 : index
    %0 = vector.load %arg1[%c0, %c0_0] : memref<64x32xbf16, #tpu.memory_space<vmem>>, vector<64x32xbf16>
    %c0_1 = arith.constant 0 : index
    %c0_2 = arith.constant 0 : index
    %1 = vector.load %arg4[%c0_1, %c0_2] : memref<32x128xbf16, #tpu.memory_space<vmem>>, vector<32x128xbf16>
    %cst = arith.constant dense<0.000000e+00> : vector<64x128xf32>
    %2 = tpu.matmul %0, %1, %cst {dimension_numbers = #tpu.dot_dimension_numbers<[1], [0], [0], [1], [0, 0, 1, 1], [], []>} : vector<64x32xbf16>, vector<32x128xbf16>, vector<64x128xf32> -> vector<64x128xf32>
    %c0_3 = arith.constant 0 : index
    %c0_4 = arith.constant 0 : index
    %3 = vector.load %arg6[%c0_3, %c0_4] : memref<1x128xf32, #tpu.memory_space<vmem>>, vector<1x128xf32>
    %4 = vector.broadcast %3 : vector<1x128xf32> to vector<64x128xf32>
    %5 = arith.addf %2, %4 : vector<64x128xf32>
    %c0_5 = arith.constant 0 : index
    %c0_6 = arith.constant 0 : index
    %6 = vector.load %arg8[%c0_5, %c0_6] : memref<64x128xf32, #tpu.memory_space<vmem>>, vector<64x128xf32>
    tpu.vector_store %arg8[%c0_5, %c0_6], %5 {strides = array<i32>} : memref<64x128xf32, #tpu.memory_space<vmem>>, vector<64x128xf32>,
    %c0_7 = arith.constant 0 : index
    %c0_8 = arith.constant 0 : index
    %7 = vector.load %arg5[%c0_7, %c0_8] : memref<32x128xbf16, #tpu.memory_space<vmem>>, vector<32x128xbf16>
    %8 = arith.extf %7 : vector<32x128xbf16> to vector<32x128xf32>
    %9 = tpu.iota {dimensions = array<i32: 1>} : vector<8x128xi32>
    %c64_i32 = arith.constant 64 : i32
    %10 = vector.broadcast %c64_i32 : i32 to vector<8x128xi32>
    %11 = arith.cmpi sge, %9, %10 : vector<8x128xi32>
    %c96_i32 = arith.constant 96 : i32
    %12 = vector.broadcast %c96_i32 : i32 to vector<8x128xi32>
    %13 = arith.cmpi slt, %9, %12 : vector<8x128xi32>
    %14 = arith.andi %11, %13 : vector<8x128xi1>
    %c0_9 = arith.constant 0 : index
    %c0_10 = arith.constant 0 : index
    %15 = vector.load %arg2[%c0_9, %c0_10] : memref<8x32xf32, #tpu.memory_space<vmem>>, vector<8x32xf32>
    %c0_11 = arith.constant 0 : index
    %c0_12 = arith.constant 0 : index
    %16 = vector.load %arg3[%c0_11, %c0_12] : memref<8x32xf32, #tpu.memory_space<vmem>>, vector<8x32xf32>
    %c0_i32 = arith.constant 0 : i32
    %c8_i32 = arith.constant 8 : i32
    %17 = arith.muli %c0_i32, %c8_i32 : i32
    %18 = tpu.assume_multiple %17, 8 : i32
    %19 = arith.index_cast %18 : i32 to index
    %c0_13 = arith.constant 0 : index
    %20 = vector.load %arg8[%19, %c0_13] : memref<64x128xf32, #tpu.memory_space<vmem>>, vector<8x128xf32>
    %cst_14 = arith.constant dense<0.000000e+00> : vector<8x128xf32>
    %21 = tpu.matmul %15, %8, %cst_14 {dimension_numbers = #tpu.dot_dimension_numbers<[1], [0], [0], [1], [0, 0, 1, 1], [], []>} : vector<8x32xf32>, vector<32x128xf32>, vector<8x128xf32> -> vector<8x128xf32>
    %22 = arith.addf %20, %21 : vector<8x128xf32>
    %23 = math.tanh %22 : vector<8x128xf32>
    %24 = arith.negf %22 : vector<8x128xf32>
    %25 = math.exp %24 : vector<8x128xf32>
    %cst_15 = arith.constant 1.000000e+00 : f32
    %26 = vector.broadcast %cst_15 : f32 to vector<8x128xf32>
    %27 = arith.addf %26, %25 : vector<8x128xf32>
    %28 = arith.divf %26, %27 : vector<8x128xf32>
    %29 = arith.select %14, %23, %28 : vector<8x128xi1>, vector<8x128xf32>
    %30 = vector.extract_strided_slice %29 {offsets = [0, 0], sizes = [8, 32], strides = [1, 1]} : vector<8x128xf32> to vector<8x32xf32>
    %31 = vector.extract_strided_slice %29 {offsets = [0, 32], sizes = [8, 32], strides = [1, 1]} : vector<8x128xf32> to vector<8x32xf32>
    %32 = vector.extract_strided_slice %29 {offsets = [0, 64], sizes = [8, 32], strides = [1, 1]} : vector<8x128xf32> to vector<8x32xf32>
    %33 = vector.extract_strided_slice %29 {offsets = [0, 96], sizes = [8, 32], strides = [1, 1]} : vector<8x128xf32> to vector<8x32xf32>
    %34 = arith.mulf %31, %16 : vector<8x32xf32>
    %35 = arith.mulf %30, %32 : vector<8x32xf32>
    %36 = arith.addf %34, %35 : vector<8x32xf32>
    %37 = math.tanh %36 : vector<8x32xf32>
    %38 = arith.mulf %33, %37 : vector<8x32xf32>
    %39 = arith.truncf %38 : vector<8x32xf32> to vector<8x32xbf16>
    %40 = arith.index_cast %18 : i32 to index
    %c0_16 = arith.constant 0 : index
    %41 = vector.load %arg7[%40, %c0_16] : memref<64x32xbf16, #tpu.memory_space<vmem>>, vector<8x32xbf16>
    tpu.vector_store %arg7[%40, %c0_16], %39 {strides = array<i32>} : memref<64x32xbf16, #tpu.memory_space<vmem>>, vector<8x32xbf16>,
    %c1_i32 = arith.constant 1 : i32
    %c8_i32_17 = arith.constant 8 : i32
    %42 = arith.muli %c1_i32, %c8_i32_17 : i32
    %43 = tpu.assume_multiple %42, 8 : i32
    %44 = arith.index_cast %43 : i32 to index
    %c0_18 = arith.constant 0 : index
    %45 = vector.load %arg8[%44, %c0_18] : memref<64x128xf32, #tpu.memory_space<vmem>>, vector<8x128xf32>
    %cst_19 = arith.constant dense<0.000000e+00> : vector<8x128xf32>
    %46 = tpu.matmul %38, %8, %cst_19 {dimension_numbers = #tpu.dot_dimension_numbers<[1], [0], [0], [1], [0, 0, 1, 1], [], []>} : vector<8x32xf32>, vector<32x128xf32>, vector<8x128xf32> -> vector<8x128xf32>
    %47 = arith.addf %45, %46 : vector<8x128xf32>
    %48 = math.tanh %47 : vector<8x128xf32>
    %49 = arith.negf %47 : vector<8x128xf32>
    %50 = math.exp %49 : vector<8x128xf32>
    %cst_20 = arith.constant 1.000000e+00 : f32
    %51 = vector.broadcast %cst_20 : f32 to vector<8x128xf32>
    %52 = arith.addf %51, %50 : vector<8x128xf32>
    %53 = arith.divf %51, %52 : vector<8x128xf32>
    %54 = arith.select %14, %48, %53 : vector<8x128xi1>, vector<8x128xf32>
    %55 = vector.extract_strided_slice %54 {offsets = [0, 0], sizes = [8, 32], strides = [1, 1]} : vector<8x128xf32> to vector<8x32xf32>
    %56 = vector.extract_strided_slice %54 {offsets = [0, 32], sizes = [8, 32], strides = [1, 1]} : vector<8x128xf32> to vector<8x32xf32>
    %57 = vector.extract_strided_slice %54 {offsets = [0, 64], sizes = [8, 32], strides = [1, 1]} : vector<8x128xf32> to vector<8x32xf32>
    %58 = vector.extract_strided_slice %54 {offsets = [0, 96], sizes = [8, 32], strides = [1, 1]} : vector<8x128xf32> to vector<8x32xf32>
    %59 = arith.mulf %56, %36 : vector<8x32xf32>
    %60 = arith.mulf %55, %57 : vector<8x32xf32>
    %61 = arith.addf %59, %60 : vector<8x32xf32>
    %62 = math.tanh %61 : vector<8x32xf32>
    %63 = arith.mulf %58, %62 : vector<8x32xf32>
    %64 = arith.truncf %63 : vector<8x32xf32> to vector<8x32xbf16>
    %65 = arith.index_cast %43 : i32 to index
    %c0_21 = arith.constant 0 : index
    %66 = vector.load %arg7[%65, %c0_21] : memref<64x32xbf16, #tpu.memory_space<vmem>>, vector<8x32xbf16>
    tpu.vector_store %arg7[%65, %c0_21], %64 {strides = array<i32>} : memref<64x32xbf16, #tpu.memory_space<vmem>>, vector<8x32xbf16>,
    %c2_i32 = arith.constant 2 : i32
    %c8_i32_22 = arith.constant 8 : i32
    %67 = arith.muli %c2_i32, %c8_i32_22 : i32
    %68 = tpu.assume_multiple %67, 8 : i32
    %69 = arith.index_cast %68 : i32 to index
    %c0_23 = arith.constant 0 : index
    %70 = vector.load %arg8[%69, %c0_23] : memref<64x128xf32, #tpu.memory_space<vmem>>, vector<8x128xf32>
    %cst_24 = arith.constant dense<0.000000e+00> : vector<8x128xf32>
    %71 = tpu.matmul %63, %8, %cst_24 {dimension_numbers = #tpu.dot_dimension_numbers<[1], [0], [0], [1], [0, 0, 1, 1], [], []>} : vector<8x32xf32>, vector<32x128xf32>, vector<8x128xf32> -> vector<8x128xf32>
    %72 = arith.addf %70, %71 : vector<8x128xf32>
    %73 = math.tanh %72 : vector<8x128xf32>
    %74 = arith.negf %72 : vector<8x128xf32>
    %75 = math.exp %74 : vector<8x128xf32>
    %cst_25 = arith.constant 1.000000e+00 : f32
    %76 = vector.broadcast %cst_25 : f32 to vector<8x128xf32>
    %77 = arith.addf %76, %75 : vector<8x128xf32>
    %78 = arith.divf %76, %77 : vector<8x128xf32>
    %79 = arith.select %14, %73, %78 : vector<8x128xi1>, vector<8x128xf32>
    %80 = vector.extract_strided_slice %79 {offsets = [0, 0], sizes = [8, 32], strides = [1, 1]} : vector<8x128xf32> to vector<8x32xf32>
    %81 = vector.extract_strided_slice %79 {offsets = [0, 32], sizes = [8, 32], strides = [1, 1]} : vector<8x128xf32> to vector<8x32xf32>
    %82 = vector.extract_strided_slice %79 {offsets = [0, 64], sizes = [8, 32], strides = [1, 1]} : vector<8x128xf32> to vector<8x32xf32>
    %83 = vector.extract_strided_slice %79 {offsets = [0, 96], sizes = [8, 32], strides = [1, 1]} : vector<8x128xf32> to vector<8x32xf32>
    %84 = arith.mulf %81, %61 : vector<8x32xf32>
    %85 = arith.mulf %80, %82 : vector<8x32xf32>
    %86 = arith.addf %84, %85 : vector<8x32xf32>
    %87 = math.tanh %86 : vector<8x32xf32>
    %88 = arith.mulf %83, %87 : vector<8x32xf32>
    %89 = arith.truncf %88 : vector<8x32xf32> to vector<8x32xbf16>
    %90 = arith.index_cast %68 : i32 to index
    %c0_26 = arith.constant 0 : index
    %91 = vector.load %arg7[%90, %c0_26] : memref<64x32xbf16, #tpu.memory_space<vmem>>, vector<8x32xbf16>
    tpu.vector_store %arg7[%90, %c0_26], %89 {strides = array<i32>} : memref<64x32xbf16, #tpu.memory_space<vmem>>, vector<8x32xbf16>,
    %c3_i32 = arith.constant 3 : i32
    %c8_i32_27 = arith.constant 8 : i32
    %92 = arith.muli %c3_i32, %c8_i32_27 : i32
    %93 = tpu.assume_multiple %92, 8 : i32
    %94 = arith.index_cast %93 : i32 to index
    %c0_28 = arith.constant 0 : index
    %95 = vector.load %arg8[%94, %c0_28] : memref<64x128xf32, #tpu.memory_space<vmem>>, vector<8x128xf32>
    %cst_29 = arith.constant dense<0.000000e+00> : vector<8x128xf32>
    %96 = tpu.matmul %88, %8, %cst_29 {dimension_numbers = #tpu.dot_dimension_numbers<[1], [0], [0], [1], [0, 0, 1, 1], [], []>} : vector<8x32xf32>, vector<32x128xf32>, vector<8x128xf32> -> vector<8x128xf32>
    %97 = arith.addf %95, %96 : vector<8x128xf32>
    %98 = math.tanh %97 : vector<8x128xf32>
    %99 = arith.negf %97 : vector<8x128xf32>
    %100 = math.exp %99 : vector<8x128xf32>
    %cst_30 = arith.constant 1.000000e+00 : f32
    %101 = vector.broadcast %cst_30 : f32 to vector<8x128xf32>
    %102 = arith.addf %101, %100 : vector<8x128xf32>
    %103 = arith.divf %101, %102 : vector<8x128xf32>
    %104 = arith.select %14, %98, %103 : vector<8x128xi1>, vector<8x128xf32>
    %105 = vector.extract_strided_slice %104 {offsets = [0, 0], sizes = [8, 32], strides = [1, 1]} : vector<8x128xf32> to vector<8x32xf32>
    %106 = vector.extract_strided_slice %104 {offsets = [0, 32], sizes = [8, 32], strides = [1, 1]} : vector<8x128xf32> to vector<8x32xf32>
    %107 = vector.extract_strided_slice %104 {offsets = [0, 64], sizes = [8, 32], strides = [1, 1]} : vector<8x128xf32> to vector<8x32xf32>
    %108 = vector.extract_strided_slice %104 {offsets = [0, 96], sizes = [8, 32], strides = [1, 1]} : vector<8x128xf32> to vector<8x32xf32>
    %109 = arith.mulf %106, %86 : vector<8x32xf32>
    %110 = arith.mulf %105, %107 : vector<8x32xf32>
    %111 = arith.addf %109, %110 : vector<8x32xf32>
    %112 = math.tanh %111 : vector<8x32xf32>
    %113 = arith.mulf %108, %112 : vector<8x32xf32>
    %114 = arith.truncf %113 : vector<8x32xf32> to vector<8x32xbf16>
    %115 = arith.index_cast %93 : i32 to index
    %c0_31 = arith.constant 0 : index
    %116 = vector.load %arg7[%115, %c0_31] : memref<64x32xbf16, #tpu.memory_space<vmem>>, vector<8x32xbf16>
    tpu.vector_store %arg7[%115, %c0_31], %114 {strides = array<i32>} : memref<64x32xbf16, #tpu.memory_space<vmem>>, vector<8x32xbf16>,
    %c4_i32 = arith.constant 4 : i32
    %c8_i32_32 = arith.constant 8 : i32
    %117 = arith.muli %c4_i32, %c8_i32_32 : i32
    %118 = tpu.assume_multiple %117, 8 : i32
    %119 = arith.index_cast %118 : i32 to index
    %c0_33 = arith.constant 0 : index
    %120 = vector.load %arg8[%119, %c0_33] : memref<64x128xf32, #tpu.memory_space<vmem>>, vector<8x128xf32>
    %cst_34 = arith.constant dense<0.000000e+00> : vector<8x128xf32>
    %121 = tpu.matmul %113, %8, %cst_34 {dimension_numbers = #tpu.dot_dimension_numbers<[1], [0], [0], [1], [0, 0, 1, 1], [], []>} : vector<8x32xf32>, vector<32x128xf32>, vector<8x128xf32> -> vector<8x128xf32>
    %122 = arith.addf %120, %121 : vector<8x128xf32>
    %123 = math.tanh %122 : vector<8x128xf32>
    %124 = arith.negf %122 : vector<8x128xf32>
    %125 = math.exp %124 : vector<8x128xf32>
    %cst_35 = arith.constant 1.000000e+00 : f32
    %126 = vector.broadcast %cst_35 : f32 to vector<8x128xf32>
    %127 = arith.addf %126, %125 : vector<8x128xf32>
    %128 = arith.divf %126, %127 : vector<8x128xf32>
    %129 = arith.select %14, %123, %128 : vector<8x128xi1>, vector<8x128xf32>
    %130 = vector.extract_strided_slice %129 {offsets = [0, 0], sizes = [8, 32], strides = [1, 1]} : vector<8x128xf32> to vector<8x32xf32>
    %131 = vector.extract_strided_slice %129 {offsets = [0, 32], sizes = [8, 32], strides = [1, 1]} : vector<8x128xf32> to vector<8x32xf32>
    %132 = vector.extract_strided_slice %129 {offsets = [0, 64], sizes = [8, 32], strides = [1, 1]} : vector<8x128xf32> to vector<8x32xf32>
    %133 = vector.extract_strided_slice %129 {offsets = [0, 96], sizes = [8, 32], strides = [1, 1]} : vector<8x128xf32> to vector<8x32xf32>
    %134 = arith.mulf %131, %111 : vector<8x32xf32>
    %135 = arith.mulf %130, %132 : vector<8x32xf32>
    %136 = arith.addf %134, %135 : vector<8x32xf32>
    %137 = math.tanh %136 : vector<8x32xf32>
    %138 = arith.mulf %133, %137 : vector<8x32xf32>
    %139 = arith.truncf %138 : vector<8x32xf32> to vector<8x32xbf16>
    %140 = arith.index_cast %118 : i32 to index
    %c0_36 = arith.constant 0 : index
    %141 = vector.load %arg7[%140, %c0_36] : memref<64x32xbf16, #tpu.memory_space<vmem>>, vector<8x32xbf16>
    tpu.vector_store %arg7[%140, %c0_36], %139 {strides = array<i32>} : memref<64x32xbf16, #tpu.memory_space<vmem>>, vector<8x32xbf16>,
    %c5_i32 = arith.constant 5 : i32
    %c8_i32_37 = arith.constant 8 : i32
    %142 = arith.muli %c5_i32, %c8_i32_37 : i32
    %143 = tpu.assume_multiple %142, 8 : i32
    %144 = arith.index_cast %143 : i32 to index
    %c0_38 = arith.constant 0 : index
    %145 = vector.load %arg8[%144, %c0_38] : memref<64x128xf32, #tpu.memory_space<vmem>>, vector<8x128xf32>
    %cst_39 = arith.constant dense<0.000000e+00> : vector<8x128xf32>
    %146 = tpu.matmul %138, %8, %cst_39 {dimension_numbers = #tpu.dot_dimension_numbers<[1], [0], [0], [1], [0, 0, 1, 1], [], []>} : vector<8x32xf32>, vector<32x128xf32>, vector<8x128xf32> -> vector<8x128xf32>
    %147 = arith.addf %145, %146 : vector<8x128xf32>
    %148 = math.tanh %147 : vector<8x128xf32>
    %149 = arith.negf %147 : vector<8x128xf32>
    %150 = math.exp %149 : vector<8x128xf32>
    %cst_40 = arith.constant 1.000000e+00 : f32
    %151 = vector.broadcast %cst_40 : f32 to vector<8x128xf32>
    %152 = arith.addf %151, %150 : vector<8x128xf32>
    %153 = arith.divf %151, %152 : vector<8x128xf32>
    %154 = arith.select %14, %148, %153 : vector<8x128xi1>, vector<8x128xf32>
    %155 = vector.extract_strided_slice %154 {offsets = [0, 0], sizes = [8, 32], strides = [1, 1]} : vector<8x128xf32> to vector<8x32xf32>
    %156 = vector.extract_strided_slice %154 {offsets = [0, 32], sizes = [8, 32], strides = [1, 1]} : vector<8x128xf32> to vector<8x32xf32>
    %157 = vector.extract_strided_slice %154 {offsets = [0, 64], sizes = [8, 32], strides = [1, 1]} : vector<8x128xf32> to vector<8x32xf32>
    %158 = vector.extract_strided_slice %154 {offsets = [0, 96], sizes = [8, 32], strides = [1, 1]} : vector<8x128xf32> to vector<8x32xf32>
    %159 = arith.mulf %156, %136 : vector<8x32xf32>
    %160 = arith.mulf %155, %157 : vector<8x32xf32>
    %161 = arith.addf %159, %160 : vector<8x32xf32>
    %162 = math.tanh %161 : vector<8x32xf32>
    %163 = arith.mulf %158, %162 : vector<8x32xf32>
    %164 = arith.truncf %163 : vector<8x32xf32> to vector<8x32xbf16>
    %165 = arith.index_cast %143 : i32 to index
    %c0_41 = arith.constant 0 : index
    %166 = vector.load %arg7[%165, %c0_41] : memref<64x32xbf16, #tpu.memory_space<vmem>>, vector<8x32xbf16>
    tpu.vector_store %arg7[%165, %c0_41], %164 {strides = array<i32>} : memref<64x32xbf16, #tpu.memory_space<vmem>>, vector<8x32xbf16>,
    %c6_i32 = arith.constant 6 : i32
    %c8_i32_42 = arith.constant 8 : i32
    %167 = arith.muli %c6_i32, %c8_i32_42 : i32
    %168 = tpu.assume_multiple %167, 8 : i32
    %169 = arith.index_cast %168 : i32 to index
    %c0_43 = arith.constant 0 : index
    %170 = vector.load %arg8[%169, %c0_43] : memref<64x128xf32, #tpu.memory_space<vmem>>, vector<8x128xf32>
    %cst_44 = arith.constant dense<0.000000e+00> : vector<8x128xf32>
    %171 = tpu.matmul %163, %8, %cst_44 {dimension_numbers = #tpu.dot_dimension_numbers<[1], [0], [0], [1], [0, 0, 1, 1], [], []>} : vector<8x32xf32>, vector<32x128xf32>, vector<8x128xf32> -> vector<8x128xf32>
    %172 = arith.addf %170, %171 : vector<8x128xf32>
    %173 = math.tanh %172 : vector<8x128xf32>
    %174 = arith.negf %172 : vector<8x128xf32>
    %175 = math.exp %174 : vector<8x128xf32>
    %cst_45 = arith.constant 1.000000e+00 : f32
    %176 = vector.broadcast %cst_45 : f32 to vector<8x128xf32>
    %177 = arith.addf %176, %175 : vector<8x128xf32>
    %178 = arith.divf %176, %177 : vector<8x128xf32>
    %179 = arith.select %14, %173, %178 : vector<8x128xi1>, vector<8x128xf32>
    %180 = vector.extract_strided_slice %179 {offsets = [0, 0], sizes = [8, 32], strides = [1, 1]} : vector<8x128xf32> to vector<8x32xf32>
    %181 = vector.extract_strided_slice %179 {offsets = [0, 32], sizes = [8, 32], strides = [1, 1]} : vector<8x128xf32> to vector<8x32xf32>
    %182 = vector.extract_strided_slice %179 {offsets = [0, 64], sizes = [8, 32], strides = [1, 1]} : vector<8x128xf32> to vector<8x32xf32>
    %183 = vector.extract_strided_slice %179 {offsets = [0, 96], sizes = [8, 32], strides = [1, 1]} : vector<8x128xf32> to vector<8x32xf32>
    %184 = arith.mulf %181, %161 : vector<8x32xf32>
    %185 = arith.mulf %180, %182 : vector<8x32xf32>
    %186 = arith.addf %184, %185 : vector<8x32xf32>
    %187 = math.tanh %186 : vector<8x32xf32>
    %188 = arith.mulf %183, %187 : vector<8x32xf32>
    %189 = arith.truncf %188 : vector<8x32xf32> to vector<8x32xbf16>
    %190 = arith.index_cast %168 : i32 to index
    %c0_46 = arith.constant 0 : index
    %191 = vector.load %arg7[%190, %c0_46] : memref<64x32xbf16, #tpu.memory_space<vmem>>, vector<8x32xbf16>
    tpu.vector_store %arg7[%190, %c0_46], %189 {strides = array<i32>} : memref<64x32xbf16, #tpu.memory_space<vmem>>, vector<8x32xbf16>,
    %c7_i32 = arith.constant 7 : i32
    %c8_i32_47 = arith.constant 8 : i32
    %192 = arith.muli %c7_i32, %c8_i32_47 : i32
    %193 = tpu.assume_multiple %192, 8 : i32
    %194 = arith.index_cast %193 : i32 to index
    %c0_48 = arith.constant 0 : index
    %195 = vector.load %arg8[%194, %c0_48] : memref<64x128xf32, #tpu.memory_space<vmem>>, vector<8x128xf32>
    %cst_49 = arith.constant dense<0.000000e+00> : vector<8x128xf32>
    %196 = tpu.matmul %188, %8, %cst_49 {dimension_numbers = #tpu.dot_dimension_numbers<[1], [0], [0], [1], [0, 0, 1, 1], [], []>} : vector<8x32xf32>, vector<32x128xf32>, vector<8x128xf32> -> vector<8x128xf32>
    %197 = arith.addf %195, %196 : vector<8x128xf32>
    %198 = math.tanh %197 : vector<8x128xf32>
    %199 = arith.negf %197 : vector<8x128xf32>
    %200 = math.exp %199 : vector<8x128xf32>
    %cst_50 = arith.constant 1.000000e+00 : f32
    %201 = vector.broadcast %cst_50 : f32 to vector<8x128xf32>
    %202 = arith.addf %201, %200 : vector<8x128xf32>
    %203 = arith.divf %201, %202 : vector<8x128xf32>
    %204 = arith.select %14, %198, %203 : vector<8x128xi1>, vector<8x128xf32>
    %205 = vector.extract_strided_slice %204 {offsets = [0, 0], sizes = [8, 32], strides = [1, 1]} : vector<8x128xf32> to vector<8x32xf32>
    %206 = vector.extract_strided_slice %204 {offsets = [0, 32], sizes = [8, 32], strides = [1, 1]} : vector<8x128xf32> to vector<8x32xf32>
    %207 = vector.extract_strided_slice %204 {offsets = [0, 64], sizes = [8, 32], strides = [1, 1]} : vector<8x128xf32> to vector<8x32xf32>
    %208 = vector.extract_strided_slice %204 {offsets = [0, 96], sizes = [8, 32], strides = [1, 1]} : vector<8x128xf32> to vector<8x32xf32>
    %209 = arith.mulf %206, %186 : vector<8x32xf32>
    %210 = arith.mulf %205, %207 : vector<8x32xf32>
    %211 = arith.addf %209, %210 : vector<8x32xf32>
    %212 = math.tanh %211 : vector<8x32xf32>
    %213 = arith.mulf %208, %212 : vector<8x32xf32>
    %214 = arith.truncf %213 : vector<8x32xf32> to vector<8x32xbf16>
    %215 = arith.index_cast %193 : i32 to index
    %c0_51 = arith.constant 0 : index
    %216 = vector.load %arg7[%215, %c0_51] : memref<64x32xbf16, #tpu.memory_space<vmem>>, vector<8x32xbf16>
    tpu.vector_store %arg7[%215, %c0_51], %214 {strides = array<i32>} : memref<64x32xbf16, #tpu.memory_space<vmem>>, vector<8x32xbf16>,
    %c8_i32_52 = arith.constant 8 : i32
    return
  }
  func.func @transform_0(%arg0: i32) -> (i32, i32) {
    %c0_i32 = arith.constant 0 : i32
    %c0_i32_0 = arith.constant 0 : i32
    %c0_i32_1 = arith.constant 0 : i32
    return %c0_i32, %c0_i32_0 : i32, i32
  }
  func.func @transform_1(%arg0: i32) -> (i32, i32) {
    %c0_i32 = arith.constant 0 : i32
    %c0_i32_0 = arith.constant 0 : i32
    %c0_i32_1 = arith.constant 0 : i32
    return %c0_i32, %c0_i32_0 : i32, i32
  }
  func.func @transform_2(%arg0: i32) -> (i32, i32) {
    %c0_i32 = arith.constant 0 : i32
    %c0_i32_0 = arith.constant 0 : i32
    %c0_i32_1 = arith.constant 0 : i32
    return %c0_i32, %c0_i32_0 : i32, i32
  }
  func.func @transform_3(%arg0: i32) -> (i32, i32) {
    %c0_i32 = arith.constant 0 : i32
    %c0_i32_0 = arith.constant 0 : i32
    %c0_i32_1 = arith.constant 0 : i32
    return %c0_i32, %c0_i32_0 : i32, i32
  }
  func.func @transform_4(%arg0: i32) -> (i32, i32) {
    %c0_i32 = arith.constant 0 : i32
    %c0_i32_0 = arith.constant 0 : i32
    %c0_i32_1 = arith.constant 0 : i32
    return %c0_i32, %c0_i32_0 : i32, i32
  }
  func.func @transform_5(%arg0: i32) -> (i32, i32) {
    %c0_i32 = arith.constant 0 : i32
    %c0_i32_0 = arith.constant 0 : i32
    %c0_i32_1 = arith.constant 0 : i32
    return %c0_i32, %c0_i32_0 : i32, i32
  }
  func.func @transform_6(%arg0: i32) -> (i32, i32) {
    %c0_i32 = arith.constant 0 : i32
    %c0_i32_0 = arith.constant 0 : i32
    %c0_i32_1 = arith.constant 0 : i32
    return %c0_i32, %c0_i32_0 : i32, i32
  }
}

</mosaic_0001>

<bundles_post_ra>
// kernel: tpu_custom_call.1
= control target key start
LH: loop header
LB: loop body
LE: loop exit
PB: predicated region body
PF: predicated region fallthrough
CT: control target
= control target key end

     0   :  { %v1405_v1 = vmov 0.0|0.0   ;;  %vm1406_vm0 = vmmov 0   ;;  %v1407_v2 = vmov 0.0   ;;  %vm75_vm1 = vcmask 261120   ;;  %s1409_s12 = smov 32   ;;  %s1692_s3 = inlined_call_operand.vmem [shape: bf16[32,128], index: 3, kind: input, shape index: {}]   ;;  %s1693_s4 = inlined_call_operand.vmem [shape: bf16[32,128], index: 4, kind: input, shape index: {}]   ;;  %s1694_s0 = inlined_call_operand.vmem [shape: bf16[64,32], index: 0, kind: input, shape index: {}]   ;;  %s1695_s1 = inlined_call_operand.vmem [shape: f32[8,32], index: 1, kind: input, shape index: {}]   ;;  %s1696_s5 = inlined_call_operand.vmem [shape: f32[1,128], index: 5, kind: input, shape index: {}]   ;;  %s1697_s2 = inlined_call_operand.vmem [shape: f32[8,32], index: 2, kind: input, shape index: {}]   ;;  %s1698_s6 = inlined_call_operand.vmem [shape: bf16[64,32], index: 6, kind: output, shape index: {}]  }
   0x1   :  { %v1335_v0 = vld [vmem:[%s1692_s3] sm:$0xff]   ;;  %1282 = vmatprep.subr.bf16.mxu1 %v1405_v1  ;;  %1202 = vmatprep.mubr.msk.f32.mxu1 %vm1406_vm0, %v1407_v2  ;;  %v1336_v4 = vld [vmem:[%s1692_s3 + $0x8] sm:$0xff]   ;;  %v169_v20 = vlaneseq  ;;  %v1339_v53 = vld [vmem:[%s1694_s0 + $0x10] sm:$0xff]   ;;  %vm287_vm5 = vcmask 257024  }
   0x2   :  { %v1454_v3 = vld [vmem:[%s1693_s4] sm:$0xff]   ;;  %1182 = vmatprep.subr.bf16.mxu0 %v1335_v0  ;;  %v1467_v6 = vld [vmem:[%s1693_s4 + $0x8] sm:$0xff]   ;;  %v1340_v54 = vld [vmem:[%s1694_s0 + $0x18] sm:$0xff]  }
   0x3   :  { %1284 = vmatpush3.bf16.msra.mxu1 %v1454_v3  ;;  %1183 = vmatpush3.bf16.msra.mxu0 %v1335_v0  ;;  %v1337_v5 = vld [vmem:[%s1694_s0] sm:$0xff]   ;;  %v1338_v7 = vld [vmem:[%s1694_s0 + $0x8] sm:$0xff]   ;;  %v170_v22 = vand.u32 127, %v169_v20 }
   0x4   :  { %1285 = vmatprep.subr.bf16.mxu1 %v1405_v1  ;;  %1184 = vmatprep.subr.bf16.mxu0 %v1336_v4  ;;  %v174_v8 = vld [vmem:[%s1695_s1] sm:$0xff] }
   0x5   :  { %1186 = vmatprep.mubr.msk.bf16.mxu0 %vm75_vm1, %v1337_v5  ;;  %v1494_v9 = vld [vmem:[%s1696_s5] ss:$0 sm:$0xff]  ;;  %vm171_vm2 = vcmp.ge.s32.totalorder %v170_v22, 64  ;;  %vm172_vm3 = vcmp.lt.s32.totalorder %v170_v22, 96  ;;  %s1408_s5 = smov 64  }
   0x6   :  { %vm1501_vm4 = vmand %vm171_vm2, %vm172_vm3  ;;  %v175_v27 = vld [vmem:[%s1697_s2] sm:$0xff] }
   0x7   :  { %1287 = vmatpush3.bf16.msra.mxu1 %v1467_v6  ;;  %1185 = vmatpush3.bf16.msra.mxu0 %v1336_v4 }
   0x8   :  { %1288 = vmatprep.subr.bf16.mxu1 %v1405_v1  ;;  %1294 = vmatprep.subr.bf16.mxu0 %v1405_v1 }
   0xa   :  { %1203 = vmatmul.mubr.msk.f32.vlgmr.msra.gmra.mrb[0].mxu1 %vm75_vm1, %v174_v8  ;;  %1187 = vmatmul.mubr.msk.bf16.vlgmr.msra.gmra.mrb[0].mxu0 %vm75_vm1, %v1338_v7 }
   0xb   :  { %1290 = vmatpush3.bf16.msra.mxu1 %v1454_v3  ;;  %1213 = vmatprep.mubr.msk.f32.mxu1 %vm1406_vm0, %v1407_v2 }
   0xc   :  { %1291 = vmatprep.subr.bf16.mxu1 %v1405_v1  ;;  %1296 = vmatpush3.bf16.msra.mxu0 %v1454_v3 }
   0xd   :  { %1297 = vmatprep.subr.bf16.mxu0 %v1405_v1  ;;  %1190 = vmatprep.mubr.msk.bf16.mxu0 %vm75_vm1, %v1339_v53 }
   0xf   :  { %1293 = vmatpush3.bf16.msra.mxu1 %v1467_v6 }
  0x10   :  { %1300 = vmatprep.subr.bf16.mxu1 %v1405_v1  ;;  %1299 = vmatpush3.bf16.msra.mxu0 %v1467_v6 }
  0x11   :  { %1306 = vmatprep.subr.bf16.mxu0 %v1405_v1 }
  0x12   :  { %1191 = vmatmul.mubr.msk.bf16.gmra.mrb[4].mxu0 %vm75_vm1, %v1340_v54 }
  0x13   :  { %1224 = vmatprep.mubr.msk.f32.mxu0 %vm1406_vm0, %v1407_v2 }
  0xdd   :  { %v246_v10 = vpop.f32.mrb[0].mxu1  ;;  %v1496_v11 = vpop.f32.mrb[0].mxu0 }
  0xde   :  { %v1204_v12 = vpop.f32.mrb[1].mxu1  ;;  %v122_v13 = vpop.f32.mrb[1].mxu0  ;;  %v131_v63 = vadd.f32 %v1496_v11, %v1494_v9 }
  0xdf   :  { %v123_v14 = vadd.f32 %v1494_v9, %v122_v13  ;;  %v1499_v15 = vpop.f32.mrb[2].mxu0 }
  0xe0   :  { %v125_v16 = vpop.f32.mrb[3].mxu0 }
  0xe1   :  { %v250_v17 = vadd.f32 %v246_v10, %v123_v14  ;;  %v126_v38 = vadd.f32 %v1494_v9, %v125_v16 }
  0xe3   :  { %v1089_v18 = vmul.f32 -1.442695, %v250_v17 }
  0xe5   :  { %1341 = vpow2.f32 %v1089_v18  ;;  %v1545_v58 = vpop.f32.mrb[4].mxu0 }
  0xe6   :  { %1343 = vtanh.f32 %v250_v17  ;;  %v1547_v59 = vpop.f32.mrb[5].mxu0 }
  0xe7   :  { %v1549_v60 = vpop.f32.mrb[6].mxu0 }
  0xe8   :  { %v1551_v61 = vpop.f32.mrb[7].mxu0 }
  0xef   :  { %v1342_v19 = vpop.eup %1341 }
  0xf0   :  { %v255_v21 = vadd.f32 1.0, %v1342_v19  ;;  %v1344_v24 = vpop.eup %1343 }
  0xf2   :  { %1345 = vrcp.f32 %v255_v21 }
  0xfc   :  { %v1346_v25 = vpop.eup %1345 }
  0xfd   :  { %v258_v26 = vsel %vm1501_vm4, %v1344_v24, %v1346_v25  ;;  %v134_v25 = vadd.f32 %v1499_v15, %v1494_v9 }
  0xfe   :  { %265 = vrot.lane.b32.xlu0 %v258_v26, %s1408_s5 }
 0x102   :  { %260 = vrot.lane.b32.xlu0 %v175_v27, %s1409_s12 }
 0x170   :  { %v266_v28 = vpop.permute.xlu0 %265 }
 0x171   :  { %v268_v29 = vmul.f32 %v266_v28, %v258_v26 }
 0x173   :  { %270 = vrot.lane.b32.xlu1 %v268_v29, %s1409_s12 }
 0x174   :  { %v261_v30 = vpop.permute.xlu0 %260 }
 0x175   :  { %v263_v31 = vmul.f32 %v261_v30, %v258_v26 }
 0x1e5   :  { %v271_v32 = vpop.permute.xlu1 %270 }
 0x1e6   :  { %v273_v33 = vadd.f32 %v271_v32, %v263_v31 }
 0x1e8   :  { %1347 = vtanh.f32 %v273_v33 }
 0x1f2   :  { %v1348_v34 = vpop.eup %1347 }
 0x1f3   :  { %276 = vrot.lane.b32.xlu1 %v1348_v34, %s1408_s5 }
 0x265   :  { %v277_v35 = vpop.permute.xlu1 %276 }
 0x266   :  { %v1514_v36 = vmul.f32 %v277_v35, %v258_v26 }
 0x268   :  { %292 = vrot.lane.b32.xlu0 %v1514_v36, %s1409_s12 }
 0x2da   :  { %v293_v37 = vpop.permute.xlu0 %292 }
 0x2db   :  { %1214 = vmatmul.mubr.msk.f32.vlgmr.msra.gmra.mrb[2].mxu1 %vm75_vm1, %v293_v37 }
 0x2dc   :  { %1302 = vmatpush3.bf16.msra.mxu1 %v1454_v3  ;;  %1235 = vmatprep.mubr.msk.f32.mxu1 %vm1406_vm0, %v1407_v2 }
 0x2dd   :  { %1303 = vmatprep.subr.bf16.mxu1 %v1405_v1 }
 0x2e0   :  { %1305 = vmatpush3.bf16.msra.mxu1 %v1467_v6 }
 0x2e1   :  { %1312 = vmatprep.subr.bf16.mxu1 %v1405_v1 }
 0x3ae   :  { %v362_v39 = vpop.f32.mrb[2].mxu1 }
 0x3af   :  { %v366_v40 = vadd.f32 %v362_v39, %v126_v38  ;;  %v1215_v41 = vpop.f32.mrb[3].mxu1 }
 0x3b1   :  { %v1092_v42 = vmul.f32 -1.442695, %v366_v40 }
 0x3b3   :  { %1349 = vpow2.f32 %v1092_v42 }
 0x3b4   :  { %1351 = vtanh.f32 %v366_v40 }
 0x3bd   :  { %v1350_v43 = vpop.eup %1349 }
 0x3be   :  { %v371_v44 = vadd.f32 1.0, %v1350_v43  ;;  %v1352_v45 = vpop.eup %1351 }
 0x3c0   :  { %1353 = vrcp.f32 %v371_v44  ;;  %v139_v44 = vadd.f32 %v1494_v9, %v1547_v59 }
 0x3ca   :  { %v1354_v46 = vpop.eup %1353 }
 0x3cb   :  { %v374_v47 = vsel %vm1501_vm4, %v1352_v45, %v1354_v46 }
 0x3cc   :  { %377 = vrot.lane.b32.xlu1 %v374_v47, %s1408_s5  ;;  %v375_v50 = vmul.f32 %v374_v47, %v273_v33 }
 0x43e   :  { %v378_v48 = vpop.permute.xlu1 %377 }
 0x43f   :  { %v380_v49 = vmul.f32 %v378_v48, %v374_v47 }
 0x441   :  { %382 = vrot.lane.b32.xlu0 %v380_v49, %s1409_s12 }
 0x4b3   :  { %v383_v51 = vpop.permute.xlu0 %382 }
 0x4b4   :  { %v385_v52 = vadd.f32 %v383_v51, %v375_v50 }
 0x4b6   :  { %1355 = vtanh.f32 %v385_v52 }
 0x4c0   :  { %v1356_v55 = vpop.eup %1355 }
 0x4c1   :  { %388 = vrot.lane.b32.xlu1 %v1356_v55, %s1408_s5 }
 0x533   :  { %v389_v56 = vpop.permute.xlu1 %388 }
 0x534   :  { %v1541_v57 = vmul.f32 %v389_v56, %v374_v47 }
 0x536   :  { %404 = vrot.lane.b32.xlu0 %v1541_v57, %s1409_s12 }
 0x5a8   :  { %v405_v62 = vpop.permute.xlu0 %404 }
 0x5a9   :  { %1225 = vmatmul.mubr.msk.f32.vlgmr.msra.gmra.mrb[8].mxu0 %vm75_vm1, %v405_v62 }
 0x5aa   :  { %1308 = vmatpush3.bf16.msra.mxu0 %v1454_v3  ;;  %1246 = vmatprep.mubr.msk.f32.mxu0 %vm1406_vm0, %v1407_v2 }
 0x5ab   :  { %1309 = vmatprep.subr.bf16.mxu0 %v1405_v1 }
 0x5ae   :  { %1311 = vmatpush3.bf16.msra.mxu0 %v1467_v6 }
 0x5af   :  { %1318 = vmatprep.subr.bf16.mxu0 %v1405_v1 }
 0x67c   :  { %v474_v0 = vpop.f32.mrb[8].mxu0 }
 0x67d   :  { %v478_v4 = vadd.f32 %v474_v0, %v131_v63  ;;  %v1226_v5 = vpop.f32.mrb[9].mxu0 }
 0x67f   :  { %v1096_v7 = vmul.f32 -1.442695, %v478_v4 }
 0x681   :  { %1357 = vpow2.f32 %v1096_v7  ;;  %v142_v7 = vadd.f32 %v1494_v9, %v1551_v61 }
 0x682   :  { %1359 = vtanh.f32 %v478_v4 }
 0x68b   :  { %v1358_v8 = vpop.eup %1357 }
 0x68c   :  { %v483_v10 = vadd.f32 1.0, %v1358_v8  ;;  %v1360_v12 = vpop.eup %1359 }
 0x68e   :  { %1361 = vrcp.f32 %v483_v10 }
 0x698   :  { %v1362_v13 = vpop.eup %1361 }
 0x699   :  { %v486_v14 = vsel %vm1501_vm4, %v1360_v12, %v1362_v13 }
 0x69a   :  { %489 = vrot.lane.b32.xlu1 %v486_v14, %s1408_s5  ;;  %v487_v11 = vmul.f32 %v486_v14, %v385_v52 }
 0x70c   :  { %v490_v16 = vpop.permute.xlu1 %489 }
 0x70d   :  { %v492_v17 = vmul.f32 %v490_v16, %v486_v14 }
 0x70f   :  { %494 = vrot.lane.b32.xlu0 %v492_v17, %s1409_s12 }
 0x781   :  { %v495_v18 = vpop.permute.xlu0 %494 }
 0x782   :  { %v497_v19 = vadd.f32 %v495_v18, %v487_v11 }
 0x784   :  { %1363 = vtanh.f32 %v497_v19 }
 0x78e   :  { %v1364_v20 = vpop.eup %1363 }
 0x78f   :  { %500 = vrot.lane.b32.xlu1 %v1364_v20, %s1408_s5 }
 0x801   :  { %v501_v21 = vpop.permute.xlu1 %500 }
 0x802   :  { %v1567_v22 = vmul.f32 %v501_v21, %v486_v14 }
 0x804   :  { %516 = vrot.lane.b32.xlu0 %v1567_v22, %s1409_s12 }
 0x876   :  { %v517_v24 = vpop.permute.xlu0 %516 }
 0x877   :  { %1236 = vmatmul.mubr.msk.f32.vlgmr.msra.gmra.mrb[4].mxu1 %vm75_vm1, %v517_v24 }
 0x878   :  { %1314 = vmatpush3.bf16.msra.mxu1 %v1454_v3  ;;  %1257 = vmatprep.mubr.msk.f32.mxu1 %vm1406_vm0, %v1407_v2 }
 0x879   :  { %1315 = vmatprep.subr.bf16.mxu1 %v1405_v1 }
 0x87c   :  { %1317 = vmatpush3.bf16.msra.mxu1 %v1467_v6 }
 0x87d   :  { %1324 = vmatprep.subr.bf16.mxu1 %v1405_v1 }
 0x94a   :  { %v586_v26 = vpop.f32.mrb[4].mxu1 }
 0x94b   :  { %v590_v27 = vadd.f32 %v586_v26, %v134_v25  ;;  %v1237_v28 = vpop.f32.mrb[5].mxu1  ;;  %v147_v25 = vadd.f32 %v1545_v58, %v1494_v9 }
 0x94d   :  { %v1100_v29 = vmul.f32 -1.442695, %v590_v27 }
 0x94f   :  { %1365 = vpow2.f32 %v1100_v29 }
 0x950   :  { %1367 = vtanh.f32 %v590_v27 }
 0x959   :  { %v1366_v30 = vpop.eup %1365 }
 0x95a   :  { %v595_v31 = vadd.f32 1.0, %v1366_v30  ;;  %v1368_v32 = vpop.eup %1367 }
 0x95c   :  { %1369 = vrcp.f32 %v595_v31 }
 0x966   :  { %v1370_v33 = vpop.eup %1369 }
 0x967   :  { %v598_v34 = vsel %vm1501_vm4, %v1368_v32, %v1370_v33 }
 0x968   :  { %601 = vrot.lane.b32.xlu1 %v598_v34, %s1408_s5  ;;  %v599_v15 = vmul.f32 %v598_v34, %v497_v19 }
 0x9da   :  { %v602_v35 = vpop.permute.xlu1 %601 }
 0x9db   :  { %v604_v37 = vmul.f32 %v602_v35, %v598_v34 }
 0x9dd   :  { %606 = vrot.lane.b32.xlu0 %v604_v37, %s1409_s12 }
 0xa4f   :  { %v607_v38 = vpop.permute.xlu0 %606 }
 0xa50   :  { %v609_v39 = vadd.f32 %v607_v38, %v599_v15 }
 0xa52   :  { %1371 = vtanh.f32 %v609_v39 }
 0xa5c   :  { %v1372_v40 = vpop.eup %1371 }
 0xa5d   :  { %612 = vrot.lane.b32.xlu1 %v1372_v40, %s1408_s5 }
 0xacf   :  { %v613_v41 = vpop.permute.xlu1 %612 }
 0xad0   :  { %v1585_v42 = vmul.f32 %v613_v41, %v598_v34 }
 0xad2   :  { %628 = vrot.lane.b32.xlu0 %v1585_v42, %s1409_s12 }
 0xb44   :  { %v629_v43 = vpop.permute.xlu0 %628 }
 0xb45   :  { %1247 = vmatmul.mubr.msk.f32.vlgmr.msra.gmra.mrb[10].mxu0 %vm75_vm1, %v629_v43 }
 0xb46   :  { %1320 = vmatpush3.bf16.msra.mxu0 %v1454_v3  ;;  %1268 = vmatprep.mubr.msk.f32.mxu0 %vm1406_vm0, %v1407_v2 }
 0xb47   :  { %1321 = vmatprep.subr.bf16.mxu0 %v1405_v1 }
 0xb4a   :  { %1323 = vmatpush3.bf16.msra.mxu0 %v1467_v6 }
 0xc18   :  { %v698_v45 = vpop.f32.mrb[10].mxu0 }
 0xc19   :  { %v702_v46 = vadd.f32 %v698_v45, %v139_v44  ;;  %v1248_v47 = vpop.f32.mrb[11].mxu0  ;;  %v150_v44 = vadd.f32 %v1549_v60, %v1494_v9  ;;  %v1119_v9 = vpack.c.bf16 %v1514_v36, %v1514_v36  ;;  %v1121_v60 = vpack.c.bf16 %v1567_v22, %v1567_v22 }
 0xc1b   :  { %v1104_v48 = vmul.f32 -1.442695, %v702_v46 }
 0xc1d   :  { %1373 = vpow2.f32 %v1104_v48 }
 0xc1e   :  { %1375 = vtanh.f32 %v702_v46 }
 0xc27   :  { %v1374_v49 = vpop.eup %1373 }
 0xc28   :  { %v707_v50 = vadd.f32 1.0, %v1374_v49  ;;  %v1376_v51 = vpop.eup %1375 }
 0xc2a   :  { %1377 = vrcp.f32 %v707_v50 }
 0xc34   :  { %v1378_v52 = vpop.eup %1377 }
 0xc35   :  { %v710_v53 = vsel %vm1501_vm4, %v1376_v51, %v1378_v52 }
 0xc36   :  { %713 = vrot.lane.b32.xlu1 %v710_v53, %s1408_s5  ;;  %v711_v56 = vmul.f32 %v710_v53, %v609_v39 }
 0xca8   :  { %v714_v54 = vpop.permute.xlu1 %713 }
 0xca9   :  { %v716_v55 = vmul.f32 %v714_v54, %v710_v53 }
 0xcab   :  { %718 = vrot.lane.b32.xlu0 %v716_v55, %s1409_s12 }
 0xd1d   :  { %v719_v59 = vpop.permute.xlu0 %718 }
 0xd1e   :  { %v721_v62 = vadd.f32 %v719_v59, %v711_v56 }
 0xd20   :  { %1379 = vtanh.f32 %v721_v62 }
 0xd2a   :  { %v1380_v63 = vpop.eup %1379 }
 0xd2b   :  { %724 = vrot.lane.b32.xlu1 %v1380_v63, %s1408_s5 }
 0xd9d   :  { %v725_v0 = vpop.permute.xlu1 %724 }
 0xd9e   :  { %v1602_v4 = vmul.f32 %v725_v0, %v710_v53 }
 0xda0   :  { %740 = vrot.lane.b32.xlu0 %v1602_v4, %s1409_s12  ;;  %v1123_v23 = vpack.c.bf16 %v1602_v4, %v1602_v4 }
 0xe12   :  { %v741_v5 = vpop.permute.xlu0 %740 }
 0xe13   :  { %1258 = vmatmul.mubr.msk.f32.vlgmr.msra.gmra.mrb[6].mxu1 %vm75_vm1, %v741_v5  ;;  %v1120_v5 = vpack.c.bf16 %v1541_v57, %v1541_v57 }
 0xe14   :  { %1326 = vmatpush3.bf16.msra.mxu1 %v1454_v3  ;;  %1279 = vmatprep.mubr.msk.f32.mxu1 %vm1406_vm0, %v1407_v2 }
 0xe15   :  { %1327 = vmatprep.subr.bf16.mxu1 %v1405_v1 }
 0xe18   :  { %1329 = vmatpush3.bf16.msra.mxu1 %v1467_v6 }
 0xee6   :  { %v810_v8 = vpop.f32.mrb[6].mxu1 }
 0xee7   :  { %v814_v10 = vadd.f32 %v810_v8, %v142_v7  ;;  %v1259_v12 = vpop.f32.mrb[7].mxu1  ;;  %v1122_v8 = vpack.c.bf16 %v1585_v42, %v1585_v42 }
 0xee9   :  { %v1108_v13 = vmul.f32 -1.442695, %v814_v10 }
 0xeeb   :  { %1381 = vpow2.f32 %v1108_v13 }
 0xeec   :  { %1383 = vtanh.f32 %v814_v10 }
 0xef5   :  { %v1382_v14 = vpop.eup %1381 }
 0xef6   :  { %v819_v16 = vadd.f32 1.0, %v1382_v14  ;;  %v1384_v3 = vpop.eup %1383 }
 0xef8   :  { %1385 = vrcp.f32 %v819_v16 }
 0xf02   :  { %v1386_v17 = vpop.eup %1385 }
 0xf03   :  { %v822_v2 = vsel %vm1501_vm4, %v1384_v3, %v1386_v17 }
 0xf04   :  { %825 = vrot.lane.b32.xlu1 %v822_v2, %s1408_s5  ;;  %v823_v61 = vmul.f32 %v822_v2, %v721_v62 }
 0xf76   :  { %v826_v1 = vpop.permute.xlu1 %825 }
 0xf77   :  { %v828_v6 = vmul.f32 %v826_v1, %v822_v2 }
 0xf79   :  { %830 = vrot.lane.b32.xlu0 %v828_v6, %s1409_s12 }
 0xfeb   :  { %v831_v11 = vpop.permute.xlu0 %830 }
 0xfec   :  { %v833_v18 = vadd.f32 %v831_v11, %v823_v61 }
 0xfee   :  { %1387 = vtanh.f32 %v833_v18 }
 0xff8   :  { %v1388_v19 = vpop.eup %1387 }
 0xff9   :  { %836 = vrot.lane.b32.xlu1 %v1388_v19, %s1408_s5 }
0x106b   :  { %v837_v20 = vpop.permute.xlu1 %836 }
0x106c   :  { %v1619_v21 = vmul.f32 %v837_v20, %v822_v2 }
0x106e   :  { %852 = vrot.lane.b32.xlu0 %v1619_v21, %s1409_s12  ;;  %v1124_v10 = vpack.c.bf16 %v1619_v21, %v1619_v21 }
0x10e0   :  { %v853_v24 = vpop.permute.xlu0 %852 }
0x10e1   :  { %1269 = vmatmul.mubr.msk.f32.vlgmr.msra.gmra.mrb[12].mxu0 %vm75_vm1, %v853_v24 }
0x11b4   :  { %v922_v26 = vpop.f32.mrb[12].mxu0 }
0x11b5   :  { %v926_v27 = vadd.f32 %v922_v26, %v147_v25  ;;  %v1270_v28 = vpop.f32.mrb[13].mxu0 }
0x11b7   :  { %v1112_v29 = vmul.f32 -1.442695, %v926_v27 }
0x11b9   :  { %1389 = vpow2.f32 %v1112_v29 }
0x11ba   :  { %1391 = vtanh.f32 %v926_v27 }
0x11c3   :  { %v1390_v30 = vpop.eup %1389 }
0x11c4   :  { %v931_v31 = vadd.f32 1.0, %v1390_v30  ;;  %v1392_v32 = vpop.eup %1391 }
0x11c6   :  { %1393 = vrcp.f32 %v931_v31 }
0x11d0   :  { %v1394_v33 = vpop.eup %1393 }
0x11d1   :  { %v934_v34 = vsel %vm1501_vm4, %v1392_v32, %v1394_v33 }
0x11d2   :  { %937 = vrot.lane.b32.xlu1 %v934_v34, %s1408_s5  ;;  %v935_v58 = vmul.f32 %v934_v34, %v833_v18 }
0x1244   :  { %v938_v35 = vpop.permute.xlu1 %937 }
0x1245   :  { %v940_v37 = vmul.f32 %v938_v35, %v934_v34 }
0x1247   :  { %942 = vrot.lane.b32.xlu0 %v940_v37, %s1409_s12 }
0x12b9   :  { %v943_v15 = vpop.permute.xlu0 %942 }
0x12ba   :  { %v945_v38 = vadd.f32 %v943_v15, %v935_v58 }
0x12bc   :  { %1395 = vtanh.f32 %v945_v38 }
0x12c6   :  { %v1396_v39 = vpop.eup %1395 }
0x12c7   :  { %948 = vrot.lane.b32.xlu1 %v1396_v39, %s1408_s5 }
0x1339   :  { %v949_v40 = vpop.permute.xlu1 %948 }
0x133a   :  { %v951_v41 = vmul.f32 %v949_v40, %v934_v34 }
0x133c   :  { %964 = vrot.lane.b32.xlu0 %v951_v41, %s1409_s12  ;;  %v1125_v56 = vpack.c.bf16 %v951_v41, %v951_v41 }
0x13ae   :  { %v965_v43 = vpop.permute.xlu0 %964 }
0x13af   :  { %1280 = vmatmul.mubr.msk.f32.vlgmr.msra.gmra.mrb[8].mxu1 %vm75_vm1, %v965_v43 }
0x1482   :  { %v1034_v45 = vpop.f32.mrb[8].mxu1 }
0x1483   :  { %v1038_v46 = vadd.f32 %v1034_v45, %v150_v44  ;;  %v1281_v47 = vpop.f32.mrb[9].mxu1 }
0x1485   :  { %v1116_v48 = vmul.f32 -1.442695, %v1038_v46 }
0x1487   :  { %1397 = vpow2.f32 %v1116_v48 }
0x1488   :  { %1399 = vtanh.f32 %v1038_v46 }
0x1491   :  { %v1398_v49 = vpop.eup %1397 }
0x1492   :  { %v1043_v50 = vadd.f32 1.0, %v1398_v49  ;;  %v1400_v51 = vpop.eup %1399 }
0x1494   :  { %1401 = vrcp.f32 %v1043_v50 }
0x149e   :  { %v1402_v52 = vpop.eup %1401 }
0x149f   :  { %v1046_v53 = vsel %vm1501_vm4, %v1400_v51, %v1402_v52 }
0x14a0   :  { %1049 = vrot.lane.b32.xlu1 %v1046_v53, %s1408_s5  ;;  %v1047_v59 = vmul.f32 %v1046_v53, %v945_v38 }
0x1512   :  { %v1050_v54 = vpop.permute.xlu1 %1049 }
0x1513   :  { %v1052_v55 = vmul.f32 %v1050_v54, %v1046_v53 }
0x1515   :  { %1054 = vrot.lane.b32.xlu0 %v1052_v55, %s1409_s12 }
0x1519   :  { %284 = vrot.lane.b32.xlu0 %v1119_v9, %s1409_s12 }
0x151d   :  { %508 = vrot.lane.b32.xlu0 %v1121_v60, %s1409_s12 }
0x1521   :  { %732 = vrot.lane.b32.xlu0 %v1123_v23, %s1409_s12 }
0x1525   :  { %956 = vrot.lane.b32.xlu0 %v1125_v56, %s1409_s12 }
0x1587   :  { %v1055_v62 = vpop.permute.xlu0 %1054 }
0x1588   :  { %v1057_v63 = vadd.f32 %v1055_v62, %v1047_v59 }
0x158a   :  { %1403 = vtanh.f32 %v1057_v63 }
0x158b   :  { %v285_v36 = vpop.permute.xlu0 %284 }
0x158c   :  { %288 = vst.msk [vmem:[%s1698_s6] sm:$0xf] %vm287_vm5, %v285_v36 }
0x158f   :  { %v509_v22 = vpop.permute.xlu0 %508 }
0x1590   :  { %1098 = vst.msk [vmem:[%s1698_s6 + $0x8] sm:$0xf] %vm287_vm5, %v509_v22 }
0x1593   :  { %v733_v0 = vpop.permute.xlu0 %732 }
0x1594   :  { %v1404_v4 = vpop.eup %1403  ;;  %1106 = vst.msk [vmem:[%s1698_s6 + $0x10] sm:$0xf] %vm287_vm5, %v733_v0 }
0x1595   :  { %1060 = vrot.lane.b32.xlu1 %v1404_v4, %s1408_s5 }
0x1597   :  { %v957_v7 = vpop.permute.xlu0 %956 }
0x1598   :  { %1114 = vst.msk [vmem:[%s1698_s6 + $0x18] sm:$0xf] %vm287_vm5, %v957_v7 }
0x1599   :  { %396 = vrot.lane.b32.xlu1 %v1120_v5, %s1409_s12 }
0x159d   :  { %620 = vrot.lane.b32.xlu1 %v1122_v8, %s1409_s12 }
0x15a1   :  { %844 = vrot.lane.b32.xlu1 %v1124_v10, %s1409_s12 }
0x1607   :  { %v1061_v12 = vpop.permute.xlu1 %1060 }
0x1608   :  { %v1063_v57 = vmul.f32 %v1061_v12, %v1046_v53 }
0x160a   :  { %v1126_v13 = vpack.c.bf16 %v1063_v57, %v1063_v57 }
0x160b   :  { %v397_v14 = vpop.permute.xlu1 %396 }
0x160c   :  { %1094 = vst.msk [vmem:[%s1698_s6 + $0x4] sm:$0xf] %vm287_vm5, %v397_v14  ;;  %1068 = vrot.lane.b32.xlu1 %v1126_v13, %s1409_s12 }
0x160f   :  { %v621_v16 = vpop.permute.xlu1 %620 }
0x1610   :  { %1102 = vst.msk [vmem:[%s1698_s6 + $0xc] sm:$0xf] %vm287_vm5, %v621_v16 }
0x1613   :  { %v845_v42 = vpop.permute.xlu1 %844 }
0x1614   :  { %1110 = vst.msk [vmem:[%s1698_s6 + $0x14] sm:$0xf] %vm287_vm5, %v845_v42 }
0x167e   :  { %v1069_v3 = vpop.permute.xlu1 %1068 }
0x167f   :  { %1118 = vst.msk [vmem:[%s1698_s6 + $0x1c] sm:$0xf] %vm287_vm5, %v1069_v3 }

</bundles_post_ra>
